<compile_context>
chip_gen: v5e
topology: v5e:2x2
jax: 0.10.0
libtpu: 0.0.40
codegen_flags: <defaults>
</compile_context>

<pallas_src>
import math

import jax
import jax.numpy as jnp
from jax import lax
from jax.experimental import pallas as pl
from jax.experimental.pallas import tpu as pltpu


def _round_up(v: int, m: int) -> int:
    return ((v + m - 1) // m) * m


def _vmem_capacity_bytes() -> int:
    try:
        return int(pltpu.get_tpu_info().vmem_capacity_bytes)
    except Exception:
        return 64 * 1024 * 1024  # conservative (v7x per-TC) fallback


# ----------------- score kernel: s_r = Vc . tanh(x_r @ W^T + b), lane-dense -----------------

def score_tile_kernel(x_ref, wt_ref, b_ref, vc_ref, s_ref):
    """x_ref : (TM, Din)  f32 rows, natural order r = b*N + n (cast to bf16 in-kernel)
    wt_ref: (Din, Dout) bf16 pre-transposed weight (resident, tiny)
    b_ref : (1, Dout)   f32 bias
    vc_ref: (1, Dout)   f32 Vc
    s_ref : (1, TM)     f32 per-row scores (lane-dense, unmasked 128-lane stores)"""
    # In-kernel cast: the activation's HBM traffic stays a single f32 read (no extra
    # wrapper-side cast pass over the whole array).
    x_bf = x_ref[...].astype(jnp.bfloat16)
    h = jnp.dot(x_bf, wt_ref[...], preferred_element_type=jnp.float32)   # MXU, f32 acc
    h = jnp.tanh(h + b_ref[...])                                         # f32 (v5e-safe)
    # Vc . h^T as an MXU contraction -> (1, TM): contiguous lane-dense writeback instead
    # of a masked (TM, 1) column store.
    s_ref[...] = lax.dot_general(
        vc_ref[...], h,
        dimension_numbers=(((1,), (1,)), ((), ())),
        preferred_element_type=jnp.float32)


def _pick_score_tile(rows, din, dout, budget_bytes, max_tile_rows):
    """Largest row tile TM whose VMEM working set fits the budget (lane padding included)."""
    din_p = _round_up(din, 128)
    dout_p = _round_up(dout, 128)
    # Resident / double-buffered small operands + slack for compiler temporaries.
    fixed = 2 * _round_up(din, 16) * dout_p * 2      # bf16 W^T (double-buffered)
    fixed += 2 * 2 * 8 * dout_p * 4                  # bias + Vc blocks (f32, padded sublanes)
    fixed += 4 * 1024 * 1024                         # misc compiler scratch margin
    per_row = (2 * din_p * 4       # x tile, f32, double-buffered
               + din_p * 2         # in-kernel bf16 copy of the x tile
               + dout_p * 4        # f32 h intermediate
               + 2 * 8 * 4)        # (1, TM) output block padded to 8 sublanes, 2 buffers
    cap = max(8, (budget_bytes - fixed) // per_row)
    tm = min(max_tile_rows, cap)
    if rows <= tm:
        return rows, 1                         # single tile: block == full array, no padding
    tm = max(128, (tm // 128) * 128)           # multi-tile: lane-dense output needs TM % 128 == 0
    return tm, pl.cdiv(rows, tm)


# --------------------------- row softmax (large B*N only) -----------------------------------

def softmax_rows_kernel(s_ref, o_ref):
    s = s_ref[...]
    m = jnp.max(s, axis=-1, keepdims=True)
    e = jnp.exp(s - m)                                                    # f32 (v5e-safe)
    o_ref[...] = e * pl.reciprocal(jnp.sum(e, axis=-1, keepdims=True), approx=True)


def _softmax_rows_pallas(s):
    B, N = s.shape
    TB = B if B <= 256 else 256
    return pl.pallas_call(
        softmax_rows_kernel,
        out_shape=jax.ShapeDtypeStruct((B, N), jnp.float32),
        grid=(pl.cdiv(B, TB),),
        in_specs=[pl.BlockSpec((TB, N), lambda i: (i, 0))],
        out_specs=pl.BlockSpec((TB, N), lambda i: (i, 0)),
        compiler_params=pltpu.CompilerParams(dimension_semantics=("parallel",)),
    )(s.astype(jnp.float32))


# -------------------------------------- wrapper ----------------------------------------------

def attn_score_forward(x, weight, bias, vc, *, max_tile_rows=2048, softmax_impl="auto"):
    """x: (B, N, Din); weight: (Dout, Din); bias: (Dout,); vc: (1, Dout). Returns (B, N) f32."""
    B, N, Din = x.shape
    Dout = weight.shape[0]
    rows = B * N

    vmem_budget = (_vmem_capacity_bytes() * 3) // 4   # ~96 MiB v5e/v6e, ~48 MiB v7x
    TM, num_tiles = _pick_score_tile(rows, Din, Dout, vmem_budget, max_tile_rows)

    x2 = x.reshape(rows, Din).astype(jnp.float32)     # contiguous reshape only; no cast copy, no pad
    wt = weight.T.astype(jnp.bfloat16)                # (Din, Dout), tiny
    b2 = bias.reshape(1, Dout).astype(jnp.float32)
    vc2 = vc.reshape(1, Dout).astype(jnp.float32)

    s_row = pl.pallas_call(
        score_tile_kernel,
        out_shape=jax.ShapeDtypeStruct((1, rows), jnp.float32),
        grid=(num_tiles,),
        in_specs=[
            # Ragged last tile (rows % TM != 0) is handled by Pallas block masking: the
            # garbage tail scores are computed but never written back.
            pl.BlockSpec((TM, Din), lambda i: (i, 0)),
            pl.BlockSpec((Din, Dout), lambda i: (0, 0)),
            pl.BlockSpec((1, Dout), lambda i: (0, 0)),
            pl.BlockSpec((1, Dout), lambda i: (0, 0)),
        ],
        out_specs=pl.BlockSpec((1, TM), lambda i: (0, i)),
        compiler_params=pltpu.CompilerParams(
            dimension_semantics=("parallel",),        # v7x: both TCs stream half the row tiles
            vmem_limit_bytes=int(vmem_budget),
        ),
        # TODO(synk): if a trace shows exposed DMA waits at very large Din, add
        # pipeline_mode=pl.Buffered(3) on the x BlockSpec (keep 2 on v7x if VMEM-tight).
    )(x2, wt, b2, vc2)

    # torch's permute(2,1,0) + reshape(c, b*n) + reshape(b, n) ordering, applied to the
    # tiny (B, N) score matrix only (B*N floats), never to the big activation.
    s_nat = s_row.reshape(B, N)                       # natural (b, n) order
    s_torch = jnp.transpose(s_nat, (1, 0)).reshape(B, N)

    if softmax_impl == "auto":
        softmax_impl = "pallas" if rows > 256 * 1024 else "jnp"
    if softmax_impl == "jnp":
        # Small/medium B*N: let XLA fuse transpose+softmax; avoids an extra kernel
        # dispatch and an extra HBM round trip of the score matrix.
        return jax.nn.softmax(s_torch, axis=1)
    return _softmax_rows_pallas(s_torch)


# ------------------------------- reference & init --------------------------------------------

def ref_forward(x, weight, bias, vc):
    """Pure-JAX replication of the PyTorch forward (for verification)."""
    out = jnp.tanh(jnp.einsum("bnd,od->bno", x, weight) + bias)   # (B, N, Dout)
    outp = jnp.transpose(out, (2, 1, 0))                          # (c=Dout, n=N, b=B)
    c, n, b = outp.shape
    flat = outp.reshape(c, b * n)
    scores = (vc @ flat).reshape(b, n)
    return jax.nn.softmax(scores, axis=1)


def init_params(key, in_features, out_features):
    """Deterministic init mirroring the module's reset_parameters shapes/ranges."""
    kw, kb, kv, kk = jax.random.split(key, 4)
    bound = 1.0 / math.sqrt(in_features)  # kaiming_uniform(a=sqrt(5)) bound == 1/sqrt(fan_in)
    weight = jax.random.uniform(kw, (out_features, in_features), jnp.float32,
                                minval=-bound, maxval=bound)
    bias = jax.random.uniform(kb, (out_features,), jnp.float32, minval=-bound, maxval=bound)
    vc = jax.random.uniform(kv, (1, out_features), jnp.float32, minval=-bound, maxval=bound)
    kc = jax.random.uniform(kk, (1,), jnp.float32, minval=-bound, maxval=bound)
    # NOTE: Kc is a parameter of the module but is unused in forward(); kept only for parity.
    return weight, bias, vc, kc


if __name__ == "__main__":
    # ---- test 1: small shapes, single-tile score kernel, fused jnp softmax path ----
    B, N = 2, 8
    in_features, out_features = 32, 32
    key = jax.random.PRNGKey(0)
    kx, kp, kx2, kp2 = jax.random.split(key, 4)

    x = jax.random.normal(kx, (B, N, in_features), jnp.float32)
    weight, bias, vc, _kc = init_params(kp, in_features, out_features)

    out = jax.block_until_ready(attn_score_forward(x, weight, bias, vc))

    ref_bf = ref_forward(x.astype(jnp.bfloat16).astype(jnp.float32),
                         weight.astype(jnp.bfloat16).astype(jnp.float32), bias, vc)
    ref32 = ref_forward(x, weight, bias, vc)
    assert out.shape == (B, N)
    assert jnp.allclose(out, ref_bf, atol=3e-3, rtol=3e-3), (out, ref_bf)
    assert jnp.allclose(out, ref32, atol=2e-2, rtol=2e-2), (out, ref32)
    assert jnp.allclose(jnp.sum(out, axis=1), jnp.ones((B,)), atol=1e-5)

    # ---- test 2: multi-tile score grid (ragged last tile, no padding copy) + Pallas softmax ----
    B2, N2 = 20, 160                       # rows = 3200 > TM=2048 -> 2 tiles, ragged tail
    in2, out2 = 64, 48                     # non-128-multiple dims exercise lane padding budget
    x_b = jax.random.normal(kx2, (B2, N2, in2), jnp.float32)
    w_b, bias_b, vc_b, _ = init_params(kp2, in2, out2)

    out_b = jax.block_until_ready(
        attn_score_forward(x_b, w_b, bias_b, vc_b, softmax_impl="pallas"))

    ref_b_bf = ref_forward(x_b.astype(jnp.bfloat16).astype(jnp.float32),
                           w_b.astype(jnp.bfloat16).astype(jnp.float32), bias_b, vc_b)
    ref_b_32 = ref_forward(x_b, w_b, bias_b, vc_b)
    assert out_b.shape == (B2, N2)
    assert jnp.allclose(out_b, ref_b_bf, atol=5e-3, rtol=5e-3), (out_b, ref_b_bf)
    assert jnp.allclose(out_b, ref_b_32, atol=2e-2, rtol=2e-2), (out_b, ref_b_32)
    assert jnp.allclose(jnp.sum(out_b, axis=1), jnp.ones((B2,)), atol=1e-2)

    print("KERNEL_OK")
</pallas_src>

<mosaic_0001>
module attributes {stable_mosaic.version = 11 : i64} {
  func.func @score_tile_kernel(%arg0: i32, %arg1: memref<16x32xf32, #tpu.memory_space<vmem>>, %arg2: memref<32x32xbf16, #tpu.memory_space<vmem>>, %arg3: memref<1x32xf32, #tpu.memory_space<vmem>>, %arg4: memref<1x32xf32, #tpu.memory_space<vmem>>, %arg5: memref<1x16xf32, #tpu.memory_space<vmem>>) attributes {dimension_semantics = [#tpu.dimension_semantics<parallel>], iteration_bounds = array<i64: 1>, scalar_prefetch = 0 : i64, scratch_operands = 0 : i64, tpu.core_type = #tpu.core_type<tc>, window_params = [{transform_indices = @transform_0, window_bounds = array<i64: 16, 32>}, {pipeline_mode = #tpu.pipeline_mode<synchronous>, transform_indices = @transform_1, window_bounds = array<i64: 32, 32>}, {pipeline_mode = #tpu.pipeline_mode<synchronous>, transform_indices = @transform_2, window_bounds = array<i64: 1, 32>}, {pipeline_mode = #tpu.pipeline_mode<synchronous>, transform_indices = @transform_3, window_bounds = array<i64: 1, 32>}, {transform_indices = @transform_4, window_bounds = array<i64: 1, 16>}]} {
    %c0 = arith.constant 0 : index
    %c0_0 = arith.constant 0 : index
    %0 = vector.load %arg1[%c0, %c0_0] : memref<16x32xf32, #tpu.memory_space<vmem>>, vector<16x32xf32>
    %1 = arith.truncf %0 : vector<16x32xf32> to vector<16x32xbf16>
    %c0_1 = arith.constant 0 : index
    %c0_2 = arith.constant 0 : index
    %2 = vector.load %arg2[%c0_1, %c0_2] : memref<32x32xbf16, #tpu.memory_space<vmem>>, vector<32x32xbf16>
    %cst = arith.constant dense<0.000000e+00> : vector<16x32xf32>
    %3 = tpu.matmul %1, %2, %cst {dimension_numbers = #tpu.dot_dimension_numbers<[1], [0], [0], [1], [0, 0, 1, 1], [], []>} : vector<16x32xbf16>, vector<32x32xbf16>, vector<16x32xf32> -> vector<16x32xf32>
    %c0_3 = arith.constant 0 : index
    %c0_4 = arith.constant 0 : index
    %4 = vector.load %arg3[%c0_3, %c0_4] : memref<1x32xf32, #tpu.memory_space<vmem>>, vector<1x32xf32>
    %5 = vector.broadcast %4 : vector<1x32xf32> to vector<16x32xf32>
    %6 = arith.addf %3, %5 : vector<16x32xf32>
    %7 = math.tanh %6 : vector<16x32xf32>
    %c0_5 = arith.constant 0 : index
    %c0_6 = arith.constant 0 : index
    %8 = vector.load %arg4[%c0_5, %c0_6] : memref<1x32xf32, #tpu.memory_space<vmem>>, vector<1x32xf32>
    %cst_7 = arith.constant dense<0.000000e+00> : vector<1x16xf32>
    %9 = tpu.matmul %8, %7, %cst_7 {dimension_numbers = #tpu.dot_dimension_numbers<[1], [1], [0], [0], [0, 0, 1, 0], [], []>} : vector<1x32xf32>, vector<16x32xf32>, vector<1x16xf32> -> vector<1x16xf32>
    %c0_8 = arith.constant 0 : index
    %c0_9 = arith.constant 0 : index
    %10 = vector.load %arg5[%c0_8, %c0_9] : memref<1x16xf32, #tpu.memory_space<vmem>>, vector<1x16xf32>
    tpu.vector_store %arg5[%c0_8, %c0_9], %9 {strides = array<i32>} : memref<1x16xf32, #tpu.memory_space<vmem>>, vector<1x16xf32>,
    return
  }
  func.func @transform_0(%arg0: i32) -> (i32, i32) {
    %c0_i32 = arith.constant 0 : i32
    %c0_i32_0 = arith.constant 0 : i32
    return %arg0, %c0_i32 : i32, i32
  }
  func.func @transform_1(%arg0: i32) -> (i32, i32) {
    %c0_i32 = arith.constant 0 : i32
    %c0_i32_0 = arith.constant 0 : i32
    %c0_i32_1 = arith.constant 0 : i32
    return %c0_i32, %c0_i32_0 : i32, i32
  }
  func.func @transform_2(%arg0: i32) -> (i32, i32) {
    %c0_i32 = arith.constant 0 : i32
    %c0_i32_0 = arith.constant 0 : i32
    %c0_i32_1 = arith.constant 0 : i32
    return %c0_i32, %c0_i32_0 : i32, i32
  }
  func.func @transform_3(%arg0: i32) -> (i32, i32) {
    %c0_i32 = arith.constant 0 : i32
    %c0_i32_0 = arith.constant 0 : i32
    %c0_i32_1 = arith.constant 0 : i32
    return %c0_i32, %c0_i32_0 : i32, i32
  }
  func.func @transform_4(%arg0: i32) -> (i32, i32) {
    %c0_i32 = arith.constant 0 : i32
    %c0_i32_0 = arith.constant 0 : i32
    return %c0_i32, %arg0 : i32, i32
  }
}

</mosaic_0001>

<bundles_post_ra>
// kernel: tpu_custom_call.1
= control target key start
LH: loop header
LB: loop body
LE: loop exit
PB: predicated region body
PF: predicated region fallthrough
CT: control target
= control target key end

     0   :  { %9 = vsyncpa [#allocation3], 0  ;;  %s295_s0 = inlined_call_operand.hbm [shape: f32[16,32], index: 0, kind: input, shape index: {}]   ;;  %s296_s1 = inlined_call_operand.hbm [shape: bf16[32,32], index: 1, kind: input, shape index: {}]   ;;  %s297_s2 = inlined_call_operand.vmem [shape: f32[1,32], index: 2, kind: input, shape index: {}]   ;;  %s298_s3 = inlined_call_operand.vmem [shape: f32[1,32], index: 3, kind: input, shape index: {}]   ;;  %s299_s4 = inlined_call_operand.hbm [shape: f32[1,16], index: 4, kind: output, shape index: {}]  }
   0x1   :  { %10 = vsyncpa [#allocation6], 0 }
   0x2   :  { %11 = vsyncpa [#allocation4], 0  ;;  %s16_s17 = sshll.u32 %s295_s0, 4  ;;  %s248_s18 = smov [#allocation2]   ;;  %s17_s17 = int_to_ptr.hbm [resolvable:$true] %s16_s17 }
   0x3   :  { %s18_s19 = sshll.u32 %s248_s18, 4  ;;  %s29_s22 = sshll.u32 %s296_s1, 4  ;;  %s19_s19 = int_to_ptr.vmem [resolvable:$true] %s18_s19  ;;  %s30_s22 = int_to_ptr.hbm [resolvable:$true] %s29_s22 }
   0x4   :  { %s249_s23 = smov 128   ;;  %s250_s24 = smov 8  }
   0x5   :  { %24 = dma.hbm_to_vmem [thread:$0]  %s17_s17, 256, %s19_s19, [#allocation3], %s249_s23, %s249_s23, %s250_s24  }
   0x6   :  { %s251_s25 = smov [#allocation5]   ;;  %s252_s27 = smov 64  }
   0x7   :  { %s31_s26 = sshll.u32 %s251_s25, 4  ;;  %s253_s28 = smov 4   ;;  %s32_s26 = int_to_ptr.vmem [resolvable:$true] %s31_s26 }
   0x8   :  { %37 = dma.hbm_to_vmem [thread:$0]  %s30_s22, 256, %s32_s26, [#allocation6], %s252_s27, %s252_s27, %s253_s28  }
   0x9   :  { %242 = dma.done.wait [#allocation3], 256  }
   0xa   :  { %243 = vsyncadd [#allocation3], 4294967040 }
   0xb   :  { %244 = dma.done.wait [#allocation6], 256  }
   0xc   :  { %245 = vsyncadd [#allocation6], 4294967040  ;;  %v157_v0 = vld [vmem:[#allocation5 + $0x8] sm:$0xff]  ;;  %v156_v1 = vld [vmem:[#allocation5] sm:$0xff]  ;;  %vm74_vm0 = vcmask 261120   ;;  %s254_s5 = smov [#allocation7]  }
   0xd   :  { %84 = vmatpush.bf16.msra.mxu0 %v157_v0  ;;  %v51_v2 = vld [vmem:[#allocation2] sm:$0xff]  ;;  %v52_v3 = vld [vmem:[#allocation2 + $0x8] sm:$0xff]  ;;  %s131_s6 = sshll.u32 %s254_s5, 4  ;;  %vm124_vm1 = vcmask 122880   ;;  %s132_s6 = int_to_ptr.vmem [resolvable:$true] %s131_s6 }
   0xe   :  { %v53_v4 = vpack.c.bf16 %v52_v3, %v51_v2  ;;  %v165_v6 = vld [vmem:[%s297_s2] ss:$0 sm:$0xff]  ;;  %s133_s2 = sshll.u32 %s299_s4, 4  ;;  %s134_s2 = int_to_ptr.hbm [resolvable:$true] %s133_s2 }
   0xf   :  { %v94_v12 = vld [vmem:[%s298_s3] sm:$0x1] }
  0x11   :  { %85 = vmatpush.bf16.msra.mxu0 %v156_v1 }
  0x14   :  { %152 = vmatmul.msk.bf16.vlgmr.msra.gmra.mxu0 %vm74_vm0, %v53_v4 }
  0x91   :  { %v87_v5 = vpop.f32.mrf.mxu0 }
  0x92   :  { %v88_v9 = vadd.f32 %v165_v6, %v87_v5 }
  0x99   :  { %v89_v7 = vpop.f32.mrf.mxu0 }
  0x9a   :  { %v90_v8 = vadd.f32 %v165_v6, %v89_v7 }
  0x9c   :  { %166 = vtanh.f32 %v90_v8 }
  0x9d   :  { %168 = vtanh.f32 %v88_v9 }
  0xa2   :  { %v167_v10 = vpop.eup %166 }
  0xa3   :  { %153 = vmatpush.xpose.msk.msra.mxu1 %vm74_vm0, %v167_v10  ;;  %v169_v11 = vpop.eup %168 }
  0xa7   :  { %154 = vmatpush.xpose.msk.msra.mxu1 %vm74_vm0, %v169_v11 }
  0xaa   :  { %155 = vmatmul.msk.f32.vlgmr.msra.gmra.mxu1 %vm74_vm0, %v94_v12 }
 0x127   :  { %v121_v13 = vpop.f32.mrf.mxu1 }
 0x128   :  { %125 = vst.msk [vmem:[#allocation7] sm:$0x1] %vm124_vm1, %v121_v13 }
 0x129   :  { %136 = dma.vmem_to_hbm [thread:$0]  %s132_s6, 16, %s134_s2, [#allocation4]  }
 0x12a   :  { %246 = dma.done.wait [#allocation4], 16  }
 0x12b   :  { %247 = vsyncadd [#allocation4], 4294967280 }
 0x12c   :  { %141 = vsyncpa [#allocation3], 1 }
 0x12d   :  { %142 = vsyncpa [#allocation6], 1 }
 0x12e   :  { %143 = vsyncpa [#allocation4], 1 }

</bundles_post_ra>
